<compile_context>
chip_gen: v7x
topology: tpu7x:2x2x1
jax: 0.10.0
libtpu: 0.0.40
codegen_flags: <defaults>
</compile_context>

<pallas_src>
import functools

import jax
import jax.numpy as jnp
from jax.experimental import pallas as pl
from jax.experimental.pallas import tpu as pltpu

latent_dim = 128
latent_dim_multiplier = 4
num_classes = 10
IN_FEATURES = latent_dim * latent_dim_multiplier  # 512

_LANE = 128
_SUBLANE = 8
_DEFAULT_TB = 2048          # 2048 * 512 * 2B (bf16) = 2 MiB per latent buffer
_MIN_PALLAS_BATCH = 256     # below this, plain XLA beats a standalone kernel


def _round_up(x, m):
    return ((x + m - 1) // m) * m


def _choose_tb(B, tb):
    """Sublane-aligned batch tile, capped so the grid has >= 2 steps (megacore)."""
    tb = max(_SUBLANE, (int(tb) // _SUBLANE) * _SUBLANE)   # force multiple of 8
    per_core = _round_up(max(-(-B // 2), 1), _SUBLANE)      # ~half the batch
    return max(_SUBLANE, min(tb, per_core))


def pad_linear_params(weight, bias, dtype=jnp.bfloat16):
    """Pad the class dim to a lane-dense 128 and cast params once (param-load time).

    weight: [F, C] (transposed vs. PyTorch's nn.Linear [C, F]); bias: [C].
    Returns w_pad: [F, 128], b_pad: [1, 128].
    """
    F, C = weight.shape
    C_pad = _round_up(C, _LANE)
    w_pad = jnp.zeros((F, C_pad), dtype).at[:, :C].set(weight.astype(dtype))
    b_pad = jnp.zeros((1, C_pad), dtype).at[0, :C].set(bias.astype(dtype))
    return w_pad, b_pad


def _linear_head_kernel(x_ref, w_ref, b_ref, o_ref):
    # x_ref: [TB, F] latent tile (streamed); w_ref: [F, C_pad] and
    # b_ref: [1, C_pad] stay resident in VMEM across all grid steps.
    acc = jnp.dot(x_ref[...], w_ref[...], preferred_element_type=jnp.float32)
    o_ref[...] = (acc + b_ref[...].astype(jnp.float32)).astype(o_ref.dtype)


@functools.partial(jax.jit, static_argnames=("n_classes", "tb"))
def linear_probe_head(latent, w_pad, b_pad, *, n_classes, tb=_DEFAULT_TB):
    """latent: [B, F] (any float dtype), w_pad: [F, 128], b_pad: [1, 128] -> [B, n_classes]."""
    B, F = latent.shape
    C_pad = w_pad.shape[1]
    assert C_pad % _LANE == 0 and b_pad.shape == (1, C_pad)

    TB = _choose_tb(B, tb)
    grid = (pl.cdiv(B, TB),)          # ragged last block; OOB writes are masked
    out_dtype = latent.dtype          # bf16 in -> bf16 out (halves writeback)

    out = pl.pallas_call(
        _linear_head_kernel,
        out_shape=jax.ShapeDtypeStruct((B, C_pad), out_dtype),
        grid_spec=pltpu.PrefetchScalarGridSpec(
            num_scalar_prefetch=0,
            grid=grid,
            in_specs=[
                # Latent tile streams with the grid (double-buffered by Pallas).
                pl.BlockSpec((TB, F), lambda i: (i, 0)),
                # Weight / bias resident in VMEM (same block every step).
                pl.BlockSpec((F, C_pad), lambda i: (0, 0)),
                pl.BlockSpec((1, C_pad), lambda i: (0, 0)),
            ],
            out_specs=pl.BlockSpec((TB, C_pad), lambda i: (i, 0)),
        ),
        compiler_params=pltpu.CompilerParams(
            # Batch tiles are independent -> shard across TCs on megacore parts.
            dimension_semantics=("parallel",),
        ),
    )(latent, w_pad, b_pad)

    # Drop the zero-padded class columns (lane padding only; batch never padded).
    return out[:, :n_classes]


def linear_probe_forward(x, w_pad, b_pad, *, n_classes=num_classes,
                         tb=_DEFAULT_TB, min_pallas_batch=_MIN_PALLAS_BATCH):
    # encode(x): encoder_module is external/frozen -> identity stand-in.
    latent = x
    B = latent.shape[0]
    if B < min_pallas_batch:
        # Small-batch / latency regime: a standalone pallas_call is dominated by
        # launch + DMA setup; plain XLA (or fusing into the encoder epilogue) wins.
        w = w_pad[:, :n_classes].astype(jnp.float32)
        b = b_pad[0, :n_classes].astype(jnp.float32)
        return (latent.astype(jnp.float32) @ w + b).astype(latent.dtype)
    return linear_probe_head(latent, w_pad, b_pad, n_classes=n_classes, tb=tb)


if __name__ == "__main__":
    key = jax.random.PRNGKey(0)
    kx, kw, kb, kx2 = jax.random.split(key, 4)

    # nn.Linear(512, 10) deterministic init: U(-1/sqrt(fan_in), 1/sqrt(fan_in)).
    bound = 1.0 / (IN_FEATURES ** 0.5)
    # PyTorch weight is [C, F]; store transposed [F, C] for the kernel.
    weight = jax.random.uniform(kw, (IN_FEATURES, num_classes), dtype=jnp.float32,
                                minval=-bound, maxval=bound)
    bias = jax.random.uniform(kb, (num_classes,), dtype=jnp.float32,
                              minval=-bound, maxval=bound)
    w_pad, b_pad = pad_linear_params(weight, bias)  # hoisted: padded/cast once

    def ref_head(lat):
        # Reference at the precision the kernel sees (bf16 operands, f32 acc).
        return (lat.astype(jnp.float32) @ w_pad[:, :num_classes].astype(jnp.float32)
                + b_pad[0, :num_classes].astype(jnp.float32))

    # 1) Multi-tile Pallas path with a ragged final block (300 = 128+128+44 rows).
    x_big = jax.random.normal(kx2, (300, IN_FEATURES), dtype=jnp.float32).astype(jnp.bfloat16)
    out_big = jax.block_until_ready(
        linear_probe_forward(x_big, w_pad, b_pad, tb=128))
    assert out_big.shape == (300, num_classes)
    assert jnp.allclose(out_big.astype(jnp.float32), ref_head(x_big),
                        atol=5e-2, rtol=5e-2)

    # 2) Tiny batch forced through the Pallas kernel (single ragged 8-row block).
    x_small = jax.random.normal(kx, (2, IN_FEATURES), dtype=jnp.float32).astype(jnp.bfloat16)
    out_small = jax.block_until_ready(
        linear_probe_forward(x_small, w_pad, b_pad, min_pallas_batch=0))
    assert out_small.shape == (2, num_classes)
    assert jnp.allclose(out_small.astype(jnp.float32), ref_head(x_small),
                        atol=5e-2, rtol=5e-2)

    # 3) Tiny batch via the default small-batch XLA dispatch (no kernel launch).
    out_xla = jax.block_until_ready(linear_probe_forward(x_small, w_pad, b_pad))
    assert out_xla.shape == (2, num_classes)
    assert jnp.allclose(out_xla.astype(jnp.float32), ref_head(x_small),
                        atol=5e-2, rtol=5e-2)

    print("KERNEL_OK")
</pallas_src>

<mosaic_0001>
module attributes {stable_mosaic.version = 11 : i64} {
  func.func @_linear_head_kernel(%arg0: i32, %arg1: memref<128x512xbf16, #tpu.memory_space<vmem>>, %arg2: memref<512x128xbf16, #tpu.memory_space<vmem>>, %arg3: memref<1x128xbf16, #tpu.memory_space<vmem>>, %arg4: memref<128x128xbf16, #tpu.memory_space<vmem>>) attributes {dimension_semantics = [#tpu.dimension_semantics<parallel>], iteration_bounds = array<i64: 3>, scalar_prefetch = 0 : i64, scratch_operands = 0 : i64, tpu.core_type = #tpu.core_type<tc>, window_params = [{transform_indices = @transform_0, window_bounds = array<i64: 128, 512>}, {pipeline_mode = #tpu.pipeline_mode<synchronous>, transform_indices = @transform_1, window_bounds = array<i64: 512, 128>}, {pipeline_mode = #tpu.pipeline_mode<synchronous>, transform_indices = @transform_2, window_bounds = array<i64: 1, 128>}, {transform_indices = @transform_3, window_bounds = array<i64: 128, 128>}]} {
    %c0 = arith.constant 0 : index
    %c0_0 = arith.constant 0 : index
    %0 = vector.load %arg1[%c0, %c0_0] : memref<128x512xbf16, #tpu.memory_space<vmem>>, vector<128x512xbf16>
    %c0_1 = arith.constant 0 : index
    %c0_2 = arith.constant 0 : index
    %1 = vector.load %arg2[%c0_1, %c0_2] : memref<512x128xbf16, #tpu.memory_space<vmem>>, vector<512x128xbf16>
    %cst = arith.constant dense<0.000000e+00> : vector<128x128xf32>
    %2 = tpu.matmul %0, %1, %cst {dimension_numbers = #tpu.dot_dimension_numbers<[1], [0], [0], [1], [0, 0, 1, 1], [], []>} : vector<128x512xbf16>, vector<512x128xbf16>, vector<128x128xf32> -> vector<128x128xf32>
    %c0_3 = arith.constant 0 : index
    %c0_4 = arith.constant 0 : index
    %3 = vector.load %arg3[%c0_3, %c0_4] : memref<1x128xbf16, #tpu.memory_space<vmem>>, vector<1x128xbf16>
    %4 = arith.extf %3 : vector<1x128xbf16> to vector<1x128xf32>
    %5 = vector.broadcast %4 : vector<1x128xf32> to vector<128x128xf32>
    %6 = arith.addf %2, %5 : vector<128x128xf32>
    %7 = arith.truncf %6 : vector<128x128xf32> to vector<128x128xbf16>
    %c0_5 = arith.constant 0 : index
    %c0_6 = arith.constant 0 : index
    %8 = vector.load %arg4[%c0_5, %c0_6] : memref<128x128xbf16, #tpu.memory_space<vmem>>, vector<128x128xbf16>
    tpu.vector_store %arg4[%c0_5, %c0_6], %7 {strides = array<i32>} : memref<128x128xbf16, #tpu.memory_space<vmem>>, vector<128x128xbf16>,
    return
  }
  func.func @transform_0(%arg0: i32) -> (i32, i32) {
    %c0_i32 = arith.constant 0 : i32
    %c0_i32_0 = arith.constant 0 : i32
    return %arg0, %c0_i32 : i32, i32
  }
  func.func @transform_1(%arg0: i32) -> (i32, i32) {
    %c0_i32 = arith.constant 0 : i32
    %c0_i32_0 = arith.constant 0 : i32
    %c0_i32_1 = arith.constant 0 : i32
    return %c0_i32, %c0_i32_0 : i32, i32
  }
  func.func @transform_2(%arg0: i32) -> (i32, i32) {
    %c0_i32 = arith.constant 0 : i32
    %c0_i32_0 = arith.constant 0 : i32
    %c0_i32_1 = arith.constant 0 : i32
    return %c0_i32, %c0_i32_0 : i32, i32
  }
  func.func @transform_3(%arg0: i32) -> (i32, i32) {
    %c0_i32 = arith.constant 0 : i32
    %c0_i32_0 = arith.constant 0 : i32
    return %arg0, %c0_i32 : i32, i32
  }
}

</mosaic_0001>

<bundles_post_ra>
// kernel: linear_probe_head.1
= control target key start
LH: loop header
LB: loop body
LE: loop exit
PB: predicated region body
PF: predicated region fallthrough
CT: control target
= control target key end

     0   :  { %8 = vsyncpa [#allocation3], 0  ;;  %s2244_s0 = inlined_call_operand.hbm [shape: bf16[300,512], index: 0, kind: input, shape index: {}]   ;;  %s2245_s1 = inlined_call_operand.hbm [shape: bf16[512,128], index: 1, kind: input, shape index: {}]   ;;  %s2246_s2 = inlined_call_operand.vmem [shape: bf16[1,128], index: 2, kind: input, shape index: {}]   ;;  %s2247_s3 = inlined_call_operand.vmem [shape: bf16[300,128], index: 3, kind: output, shape index: {}]  }
   0x1   :  { %10 = vsyncpa [#allocation3 + $0x1], 0 }
   0x2   :  { %11 = vsyncpa [#allocation5], 0  ;;  %s1932_s12 = smov 0   ;;  %s1934_s13 = smov 0  }
   0x3   :  { %s1936_s14 = smov 0   ;;  %s1938_s15 = smov 0  }
   0x4 LB: > { %s1951_s16 = sadd.s32 4294967295, %s1872_s15   ;;  %s1954_s17 = sadd.s32 1, %s1872_s15   ;;  %s1872_s15 = sphi %s1938_s15, %s2268_s15   ;;  %s1868_s14 = sphi %s1936_s14, %s2267_s14   ;;  %s1864_s13 = sphi %s1934_s13, %s2266_s13   ;;  %s1860_s12 = sphi %s1932_s12, %s2265_s12  }
   0x5   : > { %s21_s18 = ssub.s32 %s1872_s15, %s1954_s17  ;;  %s24_s19 = sadd.s32 1, %s1868_s14 }
   0x6   : > { %p22_p0 = scmp.eq.s32.totalorder %s21_s18, 0  ;;  %p31_p1 = scmp.ne.s32.totalorder %s1868_s14, %s1864_s13 }
   0x7   : > { %p32_p2 = scmp.eq.s32.totalorder %s1872_s15, 0  ;;  %p37_p3 = scmp.ne.s32.totalorder %s1864_s13, %s1860_s12 }
   0x8   : > { %s1964_s20 = scalar_select %p22_p0, %s1868_s14, %s24_s19  }
   0x9   : > { %p1966_p4 = por %p32_p2, %p31_p1  ;;  %p2248_p5 = scmp.eq.s32.totalorder %s1951_s16, 0 }
   0xa   : > { %p103_p6 = scmp.eq.s32.totalorder %s1951_s16, 2  ;;  %p1244_p7 = scmp.ge.s32.totalorder %s1872_s15, 1 }
   0xb   : > { %s2251_s21 = scalar_select %p1966_p4, 1, 0 }
   0xc   : > { %p1975_p8 = por %p2248_p5, %p37_p3  ;;  %p116_p9 = scmp.lt.s32.totalorder %s1872_s15, 4 }
   0xd   : > { %p1980_p10 = por %p103_p6, %p31_p1  ;;  %s1906_s25 = smov [#allocation4]  }
   0xe   : > { %s2252_s22 = scalar_select %p1975_p8, 1, 0 }
   0xf   : > { %s2253_s23 = scalar_select %p1980_p10, 1, 0 }
  0x10   : > { %p1984_p11 = pnand %p1244_p7, %p116_p9  ;;  %s128_s26 = sshll.u32 %s1906_s25, 4  ;;  %s129_s26 = int_to_ptr.vmem [resolvable:$true] %s128_s26 }
  0x11   : > { %s1746_s30 = scalar_lea.hbm %s2245_s1, 4096 }
  0x12   : > { %s2254_s24 = scalar_select %p1984_p11, 1, 0 }
  0x13   : > { %p1559_p12 = pneg %p1984_p11  ;;  %p1747_p0 = scmp.ne.s32.totalorder %s2245_s1, %s1746_s30 }
  0x14   : > { %p1753_p6 = scmp.lt.u32.totalorder %s1746_s30, %s2245_s1 }
  0x15   : > { %p1992_p13 = pnand %p1559_p12, %p2248_p5 }
  0x17   : > { %p1748_p1 = pneg %p1992_p13 }
  0x19   : > { %p1749_p2 = pnand %p1748_p1, %p1747_p0 }
  0x1b   : > { %p1750_p3 = pneg %p1749_p2 }
  0x1d   : > { %p1755_p7 = pnand %p1753_p6, %p1750_p3 }
  0x1f   : > { %1758 = shalt.err (!%p1755_p7)
}
  0x20   : > { %s1759_s8 = scalar_lea.vmem %s129_s26, 4096  ;;  %p1767_p10 = scmp.lt.s32.totalorder %s129_s26, %s129_s26 }
  0x21   : > { %p1760_p9 = scmp.ne.s32.totalorder %s129_s26, %s1759_s8  ;;  %p1768_p8 = scmp.lt.s32.totalorder %s1759_s8, %s1759_s8 }
  0x23   : > { %p1762_p12 = pnand %p1760_p9, %p1748_p1  ;;  %p1769_p11 = por %p1768_p8, %p1767_p10 }
  0x25   : > { %p1763_p5 = pneg %p1762_p12 }
  0x27   : > { %p1770_p4 = pnand %p1769_p11, %p1763_p5 }
  0x29   : > { %1773 = shalt.err (!%p1770_p4)
}
  0x2a   : > { %s1907_s9 = smov 64   ;;  %s1908_s10 = smov 4  }
  0x2b   : > { %1562 = dma.hbm_to_vmem [thread:$0]  (!%p1992_p13), %s2245_s1, 4096, %s129_s26, [#allocation5], %s1907_s9, %s1907_s9, %s1908_s10  }
  0x2c   : > { %p1246_p0 = scmp.ge.s32.totalorder %s1872_s15, 3 }
  0x2d   : > { %p2256_p2 = scmp.ne.s32.totalorder (!%p1246_p0), %s2251_s21, 0 }
  0x2e   : > { %141 = sbr.rel (%p1246_p0) target bundleno = 88 (0x58), region = 24 }
  0x35   : > { %144 = sbr.rel (!%p2256_p2) target bundleno = 88 (0x58), region = 28  ;;  %s145_s18 = sand.u32 (%p2256_p2), 1, %s1868_s14  }
  0x36   : > { %s1248_s19 = sshll.u32 (%p2256_p2), %s1872_s15, 4  ;;  %s1247_s25 = sshll.u32 (%p2256_p2), %s145_s18, 8 }
  0x37   : > { %s151_s28 = ssub.s32 (%p2256_p2), 38, %s1248_s19  ;;  %s2020_s30 = scalar_lea.sflag (%p2256_p2), [#allocation3], %s145_s18 }
  0x38   : > { %p152_p4 = scmp.lt.s32.totalorder (%p2256_p2), %s151_s28, 16  ;;  %s149_s26 = scalar_lea.vmem (%p2256_p2), [#allocation2], %s1247_s25 }
  0x3c   : > { %s2270_s28 = smov (!%p152_p4, %s151_s28), 16 }
  0x3d   : > { %s2017_s29 = sshll.u32 %s2270_s28, 8 }
  0x3e   : > { %s157_s27 = ssub.s32 4096, %s2017_s29 }
  0x3f   : > { %158 = vsyncadd %s2020_s30, %s157_s27  ;;  %p1251_p5 = scmp.ne.s32.totalorder %s2017_s29, 0  ;;  %s1359_s21 = sshll.u32 %s1872_s15, 12 }
  0x40   : > { %s2028_s6 = scalar_lea.hbm %s2244_s0, %s1359_s21  ;;  %s164_s7 = sshll.u32 %s149_s26, 4  ;;  %s2030_s7 = int_to_ptr.vmem [resolvable:$true] %s164_s7 }
  0x41   : > { %s1774_s8 = scalar_lea.hbm %s2028_s6, %s2017_s29  ;;  %s1778_s15 = scalar_lea.hbm %s2244_s0, 9728 }
  0x42   : > { %p1775_p8 = scmp.ne.s32.totalorder %s2028_s6, %s1774_s8  ;;  %p1779_p13 = scmp.lt.u32.totalorder %s2028_s6, %s2244_s0 }
  0x43   : > { %p1780_p1 = scmp.lt.u32.totalorder %s1778_s15, %s1774_s8  ;;  %p1782_p6 = scmp.lt.u32.totalorder %s1774_s8, %s2028_s6 }
  0x44   : > { %p1776_p10 = pnand %p1775_p8, %p1251_p5 }
  0x45   : > { %p1781_p3 = por %p1780_p1, %p1779_p13 }
  0x46   : > { %p1777_p11 = pneg %p1776_p10 }
  0x47   : > { %p1783_p7 = por %p1782_p6, %p1781_p3 }
  0x49   : > { %p1784_p9 = pnand %p1783_p7, %p1777_p11 }
  0x4b   : > { %1787 = shalt.err (!%p1784_p9)
}
  0x4c   : > { %s1788_s18 = scalar_lea.vmem %s2030_s7, %s2017_s29  ;;  %s1909_s19 = smov [#allocation2]  }
  0x4d   : > { %p1789_p12 = scmp.ne.s32.totalorder %s2030_s7, %s1788_s18  ;;  %s1792_s25 = sshll.u32 %s1909_s19, 4  ;;  %s1793_s25 = int_to_ptr.vmem [resolvable:$false] %s1792_s25 }
  0x4e   : > { %s1794_s28 = scalar_lea.vmem %s1793_s25, 8192  ;;  %p1795_p4 = scmp.lt.s32.totalorder %s2030_s7, %s1793_s25 }
  0x4f   : > { %p1790_p0 = pnand %p1789_p12, %p1251_p5  ;;  %p1796_p8 = scmp.lt.s32.totalorder %s1794_s28, %s1788_s18 }
  0x51   : > { %p1791_p2 = pneg %p1790_p0  ;;  %p1797_p10 = por %p1796_p8, %p1795_p4 }
  0x53   : > { %p1798_p13 = pnand %p1797_p10, %p1791_p2 }
  0x55   : > { %1801 = shalt.err (!%p1798_p13)
}
  0x56   : > { %s1910_s27 = smov 256   ;;  %s1911_s26 = smov 16  }
  0x57   : > { %170 = dma.hbm_to_vmem [thread:$0]  (%p1251_p5), %s2028_s6, %s2017_s29, %s2030_s7, %s2020_s30, %s1910_s27, %s1910_s27, %s1911_s26  }
  0x58 PF: > { %p2257_p11 = scmp.ne.s32.totalorder %s2254_s24, 0 }
  0x59   : > { %s2060_s21 = sand.u32 (!%p2257_p11), 1, %s1864_s13   ;;  %p2258_p1 = scmp.ne.s32.totalorder (!%p2257_p11), %s2252_s22, 0 }
  0x5a   : > { %176 = sbr.rel (%p2257_p11) target bundleno = 474 (0x1da), region = 32  ;;  %s1257_s4 = sshll.u32 (!%p2257_p11), %s2060_s21, 8 }
  0x5b   : > { %s179_s5 = scalar_lea.sflag (!%p2257_p11), [#allocation3], %s2060_s21  ;;  %s2064_s8 = scalar_lea.vmem (!%p2257_p11), [#allocation2], %s1257_s4 }
  0x61   : > { %1851 = dma.done.wait (%p2258_p1), %s179_s5, 4096  }
  0x62   : > { %1853 = vsyncadd (%p2258_p1), %s179_s5, 4294963200  ;;  %p2259_p5 = scmp.eq.s32.totalorder %s1951_s16, 0 }
  0x64   : > { %1855 = dma.done.wait (%p2259_p5), [#allocation5], 4096   ;;  %p2260_p3 = pmov %p2259_p5 }
  0x65   : > { %v1666_v0 = vld [vmem:[#allocation4 + $0x40] sm:$0xff]   ;;  %v1670_v4 = vld [vmem:[#allocation4 + $0x48] sm:$0xff]   ;;  %v1674_v8 = vld [vmem:[#allocation4 + $0x50] sm:$0xff]   ;;  %s1259_s29 = sshll.u32 %s2060_s21, 6  ;;  %p2261_p6 = scmp.ne.s32.totalorder %s2253_s23, 0 }
  0x66   : > { %1857 = vsyncadd (%p2260_p3), [#allocation5], 4294963200  ;;  %v1667_v1 = vld [vmem:[#allocation4 + $0xc0] sm:$0xff]   ;;  %1426 = vmatprep.subr.bf16.mxu0 %v1666_v0  ;;  %v1671_v5 = vld [vmem:[#allocation4 + $0xc8] sm:$0xff]   ;;  %v318_v0 = vlaneseq  ;;  %s2114_s30 = scalar_lea.vmem [#allocation6], %s1259_s29   ;;  %s1341_s6 = sshll.u32 (%p2261_p6), %s1951_s16, 4 }
  0x67   : > { %v1668_v2 = vld [vmem:[#allocation4] sm:$0xff]   ;;  %1490 = vmatprep.subr.bf16.mxu1 %v1667_v1  ;;  %v1672_v6 = vld [vmem:[#allocation4 + $0x8] sm:$0xff]   ;;  %v1675_v9 = vld [vmem:[#allocation4 + $0xd0] sm:$0xff]   ;;  %s1376_s7 = sshll.u32 (%p2261_p6), %s1951_s16, 6  ;;  %s956_s9 = ssub.s32 (%p2261_p6), 38, %s1341_s6 }
  0x68   : > { %v1669_v3 = vld [vmem:[#allocation4 + $0x80] sm:$0xff]   ;;  %1427 = vmatpush3.bf16.msra.mxu0 %v1668_v2  ;;  %v1673_v7 = vld [vmem:[#allocation4 + $0x88] sm:$0xff]   ;;  %v1676_v10 = vld [vmem:[#allocation4 + $0x10] sm:$0xff]   ;;  %v319_v1 = vshrl.u32 %v318_v0, 7  ;;  %s2145_s11 = scalar_lea.vmem (%p2261_p6), %s2247_s3, %s1376_s7   ;;  %p957_p7 = scmp.lt.s32.totalorder (%p2261_p6), %s956_s9, 16 }
  0x69   : > { %1491 = vmatpush3.bf16.msra.mxu1 %v1669_v3  ;;  %1428 = vmatprep.subr.bf16.mxu0 %v1670_v4  ;;  %v1677_v11 = vld [vmem:[#allocation4 + $0x90] sm:$0xff]   ;;  %v1678_v12 = vld [vmem:[#allocation4 + $0x58] sm:$0xff]   ;;  %v1682_v16 = vld [vmem:[#allocation4 + $0x60] sm:$0xff]  }
  0x6a   : > { %1492 = vmatprep.subr.bf16.mxu1 %v1671_v5  ;;  %v1679_v13 = vld [vmem:[#allocation4 + $0xd8] sm:$0xff]   ;;  %v1683_v17 = vld [vmem:[#allocation4 + $0xe0] sm:$0xff]   ;;  %v1686_v20 = vld [vmem:[#allocation4 + $0x68] sm:$0xff]   ;;  %v320_v4 = vsub.s32 0, %v319_v1 }
  0x6b   : > { %v1680_v14 = vld [vmem:[#allocation4 + $0x18] sm:$0xff]   ;;  %v1684_v18 = vld [vmem:[#allocation4 + $0x20] sm:$0xff]   ;;  %v1687_v21 = vld [vmem:[#allocation4 + $0xe8] sm:$0xff]  }
  0x6c   : > { %1429 = vmatpush3.bf16.msra.mxu0 %v1672_v6  ;;  %v1681_v15 = vld [vmem:[#allocation4 + $0x98] sm:$0xff]   ;;  %v1685_v19 = vld [vmem:[#allocation4 + $0xa0] sm:$0xff]   ;;  %v1688_v22 = vld [vmem:[#allocation4 + $0x28] sm:$0xff]  }
  0x6d   : > { %1493 = vmatpush3.bf16.msra.mxu1 %v1673_v7  ;;  %1430 = vmatprep.subr.bf16.mxu0 %v1674_v8  ;;  %v1689_v23 = vld [vmem:[#allocation4 + $0xa8] sm:$0xff]   ;;  %v1690_v24 = vld [vmem:[#allocation4 + $0x70] sm:$0xff]   ;;  %v1694_v28 = vld [vmem:[#allocation4 + $0x78] sm:$0xff]  }
  0x6e   : > { %1494 = vmatprep.subr.bf16.mxu1 %v1675_v9  ;;  %v1691_v25 = vld [vmem:[#allocation4 + $0xf0] sm:$0xff]   ;;  %v1695_v29 = vld [vmem:[#allocation4 + $0xf8] sm:$0xff]   ;;  %v316_v2 = vld [vmem:[%s2246_s2] sm:$0x1] }
  0x6f   : > { %v1692_v26 = vld [vmem:[#allocation4 + $0x30] sm:$0xff]   ;;  %v1696_v30 = vld [vmem:[#allocation4 + $0x38] sm:$0xff]   ;;  %v317_v3 = vunpack.c.l.bf16 %v316_v2 }
  0x70   : > { %1431 = vmatpush3.bf16.msra.mxu0 %v1676_v10  ;;  %v1693_v27 = vld [vmem:[#allocation4 + $0xb0] sm:$0xff]   ;;  %v1697_v31 = vld [vmem:[#allocation4 + $0xb8] sm:$0xff]  }
  0x71   : > { %1495 = vmatpush3.bf16.msra.mxu1 %v1677_v11  ;;  %1432 = vmatprep.subr.bf16.mxu0 %v1678_v12  ;;  %v1698_v32 = vld [vmem:[%s2064_s8] ss:$16 sps:$4 sm:$0xff]   ;;  %v1700_v33 = vld [vmem:[%s2064_s8 + $0x4] ss:$16 sps:$4 sm:$0xff]   ;;  %v1701_v34 = vld [vmem:[%s2064_s8 + $0x8] ss:$16 sps:$4 sm:$0xff]   ;;  %v2109_v6 = vrot.slane %v317_v3, %v320_v4 }
  0x72   : > { %1496 = vmatprep.subr.bf16.mxu1 %v1679_v13  ;;  %v1703_v35 = vld [vmem:[%s2064_s8 + $0xc] ss:$16 sps:$4 sm:$0xff]   ;;  %706 = vmatprep.mubr.bf16.mxu0 %v1700_v33  ;;  %v1704_v36 = vld [vmem:[%s2064_s8 + $0x24] ss:$16 sps:$4 sm:$0xff]   ;;  %v1708_v38 = vld [vmem:[%s2064_s8 + $0x20] ss:$16 sps:$4 sm:$0xff]  }
  0x73   : > { %803 = vmatprep.mubr.bf16.mxu1 %v1703_v35  ;;  %v1706_v37 = vld [vmem:[%s2064_s8 + $0x2c] ss:$16 sps:$4 sm:$0xff]   ;;  %v1709_v39 = vld [vmem:[%s2064_s8 + $0x28] ss:$16 sps:$4 sm:$0xff]   ;;  %v1710_v40 = vld [vmem:[%s2064_s8 + $0x44] ss:$16 sps:$4 sm:$0xff]  }
  0x74   : > { %1433 = vmatpush3.bf16.msra.mxu0 %v1680_v14  ;;  %v1712_v41 = vld [vmem:[%s2064_s8 + $0x4c] ss:$16 sps:$4 sm:$0xff]   ;;  %v1714_v42 = vld [vmem:[%s2064_s8 + $0x40] ss:$16 sps:$4 sm:$0xff]   ;;  %v1715_v43 = vld [vmem:[%s2064_s8 + $0x48] ss:$16 sps:$4 sm:$0xff]  }
  0x75   : > { %1497 = vmatpush3.bf16.msra.mxu1 %v1681_v15  ;;  %1434 = vmatprep.subr.bf16.mxu0 %v1682_v16  ;;  %v1716_v44 = vld [vmem:[%s2064_s8 + $0x64] ss:$16 sps:$4 sm:$0xff]   ;;  %v1718_v45 = vld [vmem:[%s2064_s8 + $0x6c] ss:$16 sps:$4 sm:$0xff]   ;;  %v1720_v46 = vld [vmem:[%s2064_s8 + $0x60] ss:$16 sps:$4 sm:$0xff]  }
  0x76   : > { %1498 = vmatprep.subr.bf16.mxu1 %v1683_v17  ;;  %v1721_v47 = vld [vmem:[%s2064_s8 + $0x68] ss:$16 sps:$4 sm:$0xff]   ;;  %v1722_v48 = vld [vmem:[%s2064_s8 + $0x84] ss:$16 sps:$4 sm:$0xff]   ;;  %v1724_v49 = vld [vmem:[%s2064_s8 + $0x8c] ss:$16 sps:$4 sm:$0xff]  }
  0x77   : > { %v1726_v50 = vld [vmem:[%s2064_s8 + $0x80] ss:$16 sps:$4 sm:$0xff]   ;;  %v1727_v51 = vld [vmem:[%s2064_s8 + $0x88] ss:$16 sps:$4 sm:$0xff]   ;;  %v1728_v52 = vld [vmem:[%s2064_s8 + $0xa4] ss:$16 sps:$4 sm:$0xff]  }
  0x78   : > { %1435 = vmatpush3.bf16.msra.mxu0 %v1684_v18  ;;  %v1730_v53 = vld [vmem:[%s2064_s8 + $0xac] ss:$16 sps:$4 sm:$0xff]   ;;  %v1732_v54 = vld [vmem:[%s2064_s8 + $0xa0] ss:$16 sps:$4 sm:$0xff]   ;;  %v1733_v55 = vld [vmem:[%s2064_s8 + $0xa8] ss:$16 sps:$4 sm:$0xff]  }
  0x79   : > { %1499 = vmatpush3.bf16.msra.mxu1 %v1685_v19  ;;  %1436 = vmatprep.subr.bf16.mxu0 %v1686_v20  ;;  %v1734_v56 = vld [vmem:[%s2064_s8 + $0xc4] ss:$16 sps:$4 sm:$0xff]   ;;  %v1736_v57 = vld [vmem:[%s2064_s8 + $0xcc] ss:$16 sps:$4 sm:$0xff]   ;;  %v1738_v58 = vld [vmem:[%s2064_s8 + $0xc0] ss:$16 sps:$4 sm:$0xff]  }
  0x7a   : > { %1500 = vmatprep.subr.bf16.mxu1 %v1687_v21  ;;  %v1739_v59 = vld [vmem:[%s2064_s8 + $0xc8] ss:$16 sps:$4 sm:$0xff]   ;;  %v1740_v60 = vld [vmem:[%s2064_s8 + $0xe4] ss:$16 sps:$4 sm:$0xff]   ;;  %v1742_v61 = vld [vmem:[%s2064_s8 + $0xec] ss:$16 sps:$4 sm:$0xff]  }
  0x7b   : > { %v1744_v62 = vld [vmem:[%s2064_s8 + $0xe0] ss:$16 sps:$4 sm:$0xff]   ;;  %v1745_v63 = vld [vmem:[%s2064_s8 + $0xe8] ss:$16 sps:$4 sm:$0xff]  }
  0x7c   : > { %1437 = vmatpush3.bf16.msra.mxu0 %v1688_v22 }
  0x7d   : > { %1501 = vmatpush3.bf16.msra.mxu1 %v1689_v23  ;;  %1438 = vmatprep.subr.bf16.mxu0 %v1690_v24 }
  0x7e   : > { %1502 = vmatprep.subr.bf16.mxu1 %v1691_v25 }
  0x80   : > { %1439 = vmatpush3.bf16.msra.mxu0 %v1692_v26 }
  0x81   : > { %1503 = vmatpush3.bf16.msra.mxu1 %v1693_v27  ;;  %1440 = vmatprep.subr.bf16.mxu0 %v1694_v28 }
  0x82   : > { %1504 = vmatprep.subr.bf16.mxu1 %v1695_v29 }
  0x84   : > { %1441 = vmatpush3.bf16.msra.mxu0 %v1696_v30 }
  0x85   : > { %1505 = vmatpush3.bf16.msra.mxu1 %v1697_v31 }
  0x87   : > { %707 = vmatmul.mubr.bf16.vlgmr.msra.gmra.mrb[0].mxu0 %v1698_v32 }
  0x88   : > { %804 = vmatmul.mubr.bf16.vlgmr.msra.gmra.mrb[0].mxu1 %v1701_v34  ;;  %714 = vmatprep.mubr.bf16.mxu0 %v1704_v36 }
  0x89   : > { %811 = vmatprep.mubr.bf16.mxu1 %v1706_v37 }
  0x8f   : > { %715 = vmatmul.mubr.bf16.gmra.mrb[4].mxu0 %v1708_v38 }
  0x90   : > { %812 = vmatmul.mubr.bf16.gmra.mrb[4].mxu1 %v1709_v39  ;;  %722 = vmatprep.mubr.bf16.mxu0 %v1710_v40 }
  0x91   : > { %819 = vmatprep.mubr.bf16.mxu1 %v1712_v41 }
  0x97   : > { %723 = vmatmul.mubr.bf16.gmra.mrb[8].mxu0 %v1714_v42 }
  0x98   : > { %820 = vmatmul.mubr.bf16.gmra.mrb[8].mxu1 %v1715_v43  ;;  %730 = vmatprep.mubr.bf16.mxu0 %v1716_v44 }
  0x99   : > { %827 = vmatprep.mubr.bf16.mxu1 %v1718_v45 }
  0x9f   : > { %731 = vmatmul.mubr.bf16.gmra.mrb[12].mxu0 %v1720_v46 }
  0xa0   : > { %828 = vmatmul.mubr.bf16.gmra.mrb[12].mxu1 %v1721_v47  ;;  %738 = vmatprep.mubr.bf16.mxu0 %v1722_v48 }
  0xa1   : > { %835 = vmatprep.mubr.bf16.mxu1 %v1724_v49 }
  0xa7   : > { %739 = vmatmul.mubr.bf16.gmra.mrb[16].mxu0 %v1726_v50 }
  0xa8   : > { %836 = vmatmul.mubr.bf16.gmra.mrb[16].mxu1 %v1727_v51  ;;  %746 = vmatprep.mubr.bf16.mxu0 %v1728_v52 }
  0xa9   : > { %843 = vmatprep.mubr.bf16.mxu1 %v1730_v53 }
  0xaf   : > { %747 = vmatmul.mubr.bf16.gmra.mrb[20].mxu0 %v1732_v54 }
  0xb0   : > { %844 = vmatmul.mubr.bf16.gmra.mrb[20].mxu1 %v1733_v55  ;;  %754 = vmatprep.mubr.bf16.mxu0 %v1734_v56 }
  0xb1   : > { %851 = vmatprep.mubr.bf16.mxu1 %v1736_v57 }
  0xb7   : > { %755 = vmatmul.mubr.bf16.gmra.mrb[24].mxu0 %v1738_v58 }
  0xb8   : > { %852 = vmatmul.mubr.bf16.gmra.mrb[24].mxu1 %v1739_v59  ;;  %762 = vmatprep.mubr.bf16.mxu0 %v1740_v60 }
  0xb9   : > { %859 = vmatprep.mubr.bf16.mxu1 %v1742_v61 }
  0xbf   : > { %763 = vmatmul.mubr.bf16.gmra.mrb[28].mxu0 %v1744_v62 }
  0xc0   : > { %860 = vmatmul.mubr.bf16.gmra.mrb[28].mxu1 %v1745_v63 }
 0x15a   : > { %v1442_v5 = vpop.f32.mrb[0].mxu0 }
 0x15b   : > { %v1506_v7 = vpop.f32.mrb[0].mxu1  ;;  %v1443_v8 = vpop.f32.mrb[1].mxu0 }
 0x15c   : > { %v1444_v9 = vadd.f32 %v1443_v8, %v1442_v5  ;;  %v1507_v10 = vpop.f32.mrb[1].mxu1  ;;  %v1445_v11 = vpop.f32.mrb[2].mxu0 }
 0x15d   : > { %v1508_v12 = vadd.f32 %v1507_v10, %v1506_v7  ;;  %v1509_v13 = vpop.f32.mrb[2].mxu1  ;;  %v1446_v14 = vpop.f32.mrb[3].mxu0 }
 0x15e   : > { %v709_v15 = vadd.f32 %v1444_v9, %v2109_v6  ;;  %v1447_v16 = vadd.f32 %v1446_v14, %v1445_v11  ;;  %v1510_v17 = vpop.f32.mrb[3].mxu1 }
 0x15f   : > { %v1511_v18 = vadd.f32 %v1510_v17, %v1509_v13 }
 0x160   : > { %v806_v19 = vadd.f32 %v1508_v12, %v709_v15  ;;  %v712_v20 = vadd.f32 %v1447_v16, %v2109_v6 }
 0x162   : > { %v809_v21 = vadd.f32 %v1511_v18, %v712_v20  ;;  %v1448_v22 = vpop.f32.mrb[4].mxu0 }
 0x163   : > { %v1512_v23 = vpop.f32.mrb[4].mxu1  ;;  %v1449_v24 = vpop.f32.mrb[5].mxu0 }
 0x164   : > { %v1382_v25 = vpack.c.bf16 %v809_v21, %v806_v19  ;;  %v1450_v26 = vadd.f32 %v1449_v24, %v1448_v22  ;;  %v1513_v27 = vpop.f32.mrb[5].mxu1  ;;  %v1451_v28 = vpop.f32.mrb[6].mxu0 }
 0x165   : > { %v1514_v29 = vadd.f32 %v1513_v27, %v1512_v23  ;;  %v1515_v30 = vpop.f32.mrb[6].mxu1  ;;  %v1452_v31 = vpop.f32.mrb[7].mxu0 }
 0x166   : > { %1383 = vst [vmem:[%s2114_s30] sm:$0xff] %v1382_v25   ;;  %v717_v32 = vadd.f32 %v1450_v26, %v2109_v6  ;;  %v1453_v33 = vadd.f32 %v1452_v31, %v1451_v28  ;;  %v1516_v34 = vpop.f32.mrb[7].mxu1 }
 0x167   : > { %v1517_v35 = vadd.f32 %v1516_v34, %v1515_v30 }
 0x168   : > { %v814_v36 = vadd.f32 %v1514_v29, %v717_v32  ;;  %v720_v37 = vadd.f32 %v1453_v33, %v2109_v6 }
 0x16a   : > { %v817_v38 = vadd.f32 %v1517_v35, %v720_v37  ;;  %v1454_v39 = vpop.f32.mrb[8].mxu0 }
 0x16b   : > { %v1518_v40 = vpop.f32.mrb[8].mxu1  ;;  %v1455_v41 = vpop.f32.mrb[9].mxu0 }
 0x16c   : > { %v1387_v42 = vpack.c.bf16 %v817_v38, %v814_v36  ;;  %v1456_v43 = vadd.f32 %v1455_v41, %v1454_v39  ;;  %v1519_v44 = vpop.f32.mrb[9].mxu1  ;;  %v1457_v45 = vpop.f32.mrb[10].mxu0 }
 0x16d   : > { %v1520_v46 = vadd.f32 %v1519_v44, %v1518_v40  ;;  %v1521_v47 = vpop.f32.mrb[10].mxu1  ;;  %v1458_v48 = vpop.f32.mrb[11].mxu0 }
 0x16e   : > { %1419 = vst [vmem:[%s2114_s30 + $0x8] sm:$0xff] %v1387_v42   ;;  %v725_v49 = vadd.f32 %v1456_v43, %v2109_v6  ;;  %v1459_v50 = vadd.f32 %v1458_v48, %v1457_v45  ;;  %v1522_v51 = vpop.f32.mrb[11].mxu1 }
 0x16f   : > { %v1523_v52 = vadd.f32 %v1522_v51, %v1521_v47 }
 0x170   : > { %v822_v53 = vadd.f32 %v1520_v46, %v725_v49  ;;  %v728_v54 = vadd.f32 %v1459_v50, %v2109_v6 }
 0x172   : > { %v825_v55 = vadd.f32 %v1523_v52, %v728_v54  ;;  %v1460_v56 = vpop.f32.mrb[12].mxu0 }
 0x173   : > { %v1524_v57 = vpop.f32.mrb[12].mxu1  ;;  %v1461_v58 = vpop.f32.mrb[13].mxu0 }
 0x174   : > { %v1392_v59 = vpack.c.bf16 %v825_v55, %v822_v53  ;;  %v1462_v60 = vadd.f32 %v1461_v58, %v1460_v56  ;;  %v1525_v61 = vpop.f32.mrb[13].mxu1  ;;  %v1463_v62 = vpop.f32.mrb[14].mxu0 }
 0x175   : > { %v1526_v63 = vadd.f32 %v1525_v61, %v1524_v57  ;;  %v1527_v0 = vpop.f32.mrb[14].mxu1  ;;  %v1464_v1 = vpop.f32.mrb[15].mxu0 }
 0x176   : > { %1420 = vst [vmem:[%s2114_s30 + $0x10] sm:$0xff] %v1392_v59   ;;  %v733_v2 = vadd.f32 %v1462_v60, %v2109_v6  ;;  %v1465_v3 = vadd.f32 %v1464_v1, %v1463_v62  ;;  %v1528_v4 = vpop.f32.mrb[15].mxu1 }
 0x177   : > { %v1529_v5 = vadd.f32 %v1528_v4, %v1527_v0 }
 0x178   : > { %v830_v7 = vadd.f32 %v1526_v63, %v733_v2  ;;  %v736_v8 = vadd.f32 %v1465_v3, %v2109_v6 }
 0x17a   : > { %v833_v9 = vadd.f32 %v1529_v5, %v736_v8  ;;  %v1466_v10 = vpop.f32.mrb[16].mxu0 }
 0x17b   : > { %v1530_v11 = vpop.f32.mrb[16].mxu1  ;;  %v1467_v12 = vpop.f32.mrb[17].mxu0 }
 0x17c   : > { %v1397_v13 = vpack.c.bf16 %v833_v9, %v830_v7  ;;  %v1468_v14 = vadd.f32 %v1467_v12, %v1466_v10  ;;  %v1531_v15 = vpop.f32.mrb[17].mxu1  ;;  %v1469_v16 = vpop.f32.mrb[18].mxu0 }
 0x17d   : > { %v1532_v17 = vadd.f32 %v1531_v15, %v1530_v11  ;;  %v1533_v18 = vpop.f32.mrb[18].mxu1  ;;  %v1470_v19 = vpop.f32.mrb[19].mxu0 }
 0x17e   : > { %1421 = vst [vmem:[%s2114_s30 + $0x18] sm:$0xff] %v1397_v13   ;;  %v741_v20 = vadd.f32 %v1468_v14, %v2109_v6  ;;  %v1471_v21 = vadd.f32 %v1470_v19, %v1469_v16  ;;  %v1534_v22 = vpop.f32.mrb[19].mxu1 }
 0x17f   : > { %v1535_v23 = vadd.f32 %v1534_v22, %v1533_v18 }
 0x180   : > { %v838_v24 = vadd.f32 %v1532_v17, %v741_v20  ;;  %v744_v25 = vadd.f32 %v1471_v21, %v2109_v6 }
 0x182   : > { %v841_v26 = vadd.f32 %v1535_v23, %v744_v25  ;;  %v1472_v27 = vpop.f32.mrb[20].mxu0 }
 0x183   : > { %v1536_v28 = vpop.f32.mrb[20].mxu1  ;;  %v1473_v29 = vpop.f32.mrb[21].mxu0 }
 0x184   : > { %v1402_v30 = vpack.c.bf16 %v841_v26, %v838_v24  ;;  %v1474_v31 = vadd.f32 %v1473_v29, %v1472_v27  ;;  %v1537_v32 = vpop.f32.mrb[21].mxu1  ;;  %v1475_v33 = vpop.f32.mrb[22].mxu0 }
 0x185   : > { %v1538_v34 = vadd.f32 %v1537_v32, %v1536_v28  ;;  %v1539_v35 = vpop.f32.mrb[22].mxu1  ;;  %v1476_v36 = vpop.f32.mrb[23].mxu0 }
 0x186   : > { %1422 = vst [vmem:[%s2114_s30 + $0x20] sm:$0xff] %v1402_v30   ;;  %v749_v37 = vadd.f32 %v1474_v31, %v2109_v6  ;;  %v1477_v38 = vadd.f32 %v1476_v36, %v1475_v33  ;;  %v1540_v39 = vpop.f32.mrb[23].mxu1 }
 0x187   : > { %v1541_v40 = vadd.f32 %v1540_v39, %v1539_v35 }
 0x188   : > { %v846_v41 = vadd.f32 %v1538_v34, %v749_v37  ;;  %v752_v42 = vadd.f32 %v1477_v38, %v2109_v6 }
 0x18a   : > { %v849_v43 = vadd.f32 %v1541_v40, %v752_v42  ;;  %v1478_v44 = vpop.f32.mrb[24].mxu0 }
 0x18b   : > { %v1542_v45 = vpop.f32.mrb[24].mxu1  ;;  %v1479_v46 = vpop.f32.mrb[25].mxu0 }
 0x18c   : > { %v1407_v47 = vpack.c.bf16 %v849_v43, %v846_v41  ;;  %v1480_v48 = vadd.f32 %v1479_v46, %v1478_v44  ;;  %v1543_v49 = vpop.f32.mrb[25].mxu1  ;;  %v1481_v50 = vpop.f32.mrb[26].mxu0 }
 0x18d   : > { %v1544_v51 = vadd.f32 %v1543_v49, %v1542_v45  ;;  %v1545_v52 = vpop.f32.mrb[26].mxu1  ;;  %v1482_v53 = vpop.f32.mrb[27].mxu0 }
 0x18e   : > { %1423 = vst [vmem:[%s2114_s30 + $0x28] sm:$0xff] %v1407_v47   ;;  %v757_v54 = vadd.f32 %v1480_v48, %v2109_v6  ;;  %v1483_v55 = vadd.f32 %v1482_v53, %v1481_v50  ;;  %v1546_v56 = vpop.f32.mrb[27].mxu1 }
 0x18f   : > { %v1547_v57 = vadd.f32 %v1546_v56, %v1545_v52 }
 0x190   : > { %v854_v58 = vadd.f32 %v1544_v51, %v757_v54  ;;  %v760_v59 = vadd.f32 %v1483_v55, %v2109_v6 }
 0x192   : > { %v857_v60 = vadd.f32 %v1547_v57, %v760_v59  ;;  %v1484_v61 = vpop.f32.mrb[28].mxu0 }
 0x193   : > { %v1548_v62 = vpop.f32.mrb[28].mxu1  ;;  %v1485_v63 = vpop.f32.mrb[29].mxu0 }
 0x194   : > { %v1412_v0 = vpack.c.bf16 %v857_v60, %v854_v58  ;;  %v1486_v1 = vadd.f32 %v1485_v63, %v1484_v61  ;;  %v1549_v2 = vpop.f32.mrb[29].mxu1  ;;  %v1487_v3 = vpop.f32.mrb[30].mxu0 }
 0x195   : > { %v1550_v4 = vadd.f32 %v1549_v2, %v1548_v62  ;;  %v1551_v5 = vpop.f32.mrb[30].mxu1  ;;  %v1488_v7 = vpop.f32.mrb[31].mxu0 }
 0x196   : > { %1424 = vst [vmem:[%s2114_s30 + $0x30] sm:$0xff] %v1412_v0   ;;  %v765_v8 = vadd.f32 %v1486_v1, %v2109_v6  ;;  %v1489_v9 = vadd.f32 %v1488_v7, %v1487_v3  ;;  %v1552_v10 = vpop.f32.mrb[31].mxu1 }
 0x197   : > { %v1553_v11 = vadd.f32 %v1552_v10, %v1551_v5 }
 0x198   : > { %v862_v12 = vadd.f32 %v1550_v4, %v765_v8  ;;  %v768_v13 = vadd.f32 %v1489_v9, %v2109_v6  ;;  %954 = sbr.rel (!%p2261_p6) target bundleno = 474 (0x1da), region = 44 }
 0x19a   : > { %v865_v14 = vadd.f32 %v1553_v11, %v768_v13 }
 0x19c   : > { %v1417_v15 = vpack.c.bf16 %v865_v14, %v862_v12 }
 0x19e   : > { %1425 = vst [vmem:[%s2114_s30 + $0x38] sm:$0xff] %v1417_v15  }
 0x19f   : > { %s2272_s9 = smov (!%p957_p7, %s956_s9), 16 }
 0x1a0   : > { %s1342_s12 = sshll.u32 %s2272_s9, 6 }
 0x1a1   : > { %p1345_p9 = scmp.eq.s32.totalorder %s1342_s12, 0 }
 0x1a2   : > { %s2151_s23 = sshrl.u32 (!%p1345_p9), %s2272_s9, 4 }
 0x1a3   : > { %965 = sbr.rel (%p1345_p9) target bundleno = 474 (0x1da), region = 48  ;;  %p1346_p12 = scmp.le.s32.totalorder (!%p1345_p9), %s2151_s23, 0 }
 0x1aa   : > { %1187 = sbr.rel (%p1346_p12) target bundleno = 453 (0x1c5), region = 126  ;;  %s2262_s16 = smov (!%p1346_p12), %s2145_s11 }
 0x1ab   : > { %s2263_s18 = smov (!%p1346_p12), %s2114_s30  ;;  %s2160_s19 = smov (!%p1346_p12), 0  }
 0x1ac   : > { %s2162_s25 = smov (!%p1346_p12), 0  }
 0x1b1 LB: >> { %v981_v6 = vld [vmem:[%s1880_s18] sm:$0xf]  ;;  %v983_v16 = vld [vmem:[%s1880_s18 + $0x4] sm:$0xf]  ;;  %v985_v17 = vld [vmem:[%s1880_s18 + $0x8] sm:$0xf]  ;;  %s1888_s25 = sphi %s2162_s25, %s975_s25   ;;  %s1884_s19 = sphi %s2160_s19, %s2264_s19   ;;  %s1880_s18 = sphi %s2263_s18, %s1018_s18   ;;  %s1876_s16 = sphi %s2262_s16, %s1019_s16  }
 0x1b2   : >> { %982 = vst [vmem:[%s1876_s16] sm:$0xf] %v981_v6  ;;  %984 = vst [vmem:[%s1876_s16 + $0x4] sm:$0xf] %v983_v16  ;;  %v987_v18 = vld [vmem:[%s1880_s18 + $0xc] sm:$0xf]  ;;  %s1013_s28 = sadd.s32 1, %s1884_s19 }
 0x1b3   : >> { %986 = vst [vmem:[%s1876_s16 + $0x8] sm:$0xf] %v985_v17  ;;  %v989_v19 = vld [vmem:[%s1880_s18 + $0x10] sm:$0xf]  ;;  %v991_v20 = vld [vmem:[%s1880_s18 + $0x14] sm:$0xf]  ;;  %p1014_p0 = scmp.ge.s32.totalorder %s1013_s28, %s2151_s23 }
 0x1b4   : >> { %988 = vst [vmem:[%s1876_s16 + $0xc] sm:$0xf] %v987_v18  ;;  %990 = vst [vmem:[%s1876_s16 + $0x10] sm:$0xf] %v989_v19  ;;  %v993_v21 = vld [vmem:[%s1880_s18 + $0x18] sm:$0xf] }
 0x1b5   : >> { %992 = vst [vmem:[%s1876_s16 + $0x14] sm:$0xf] %v991_v20  ;;  %v995_v22 = vld [vmem:[%s1880_s18 + $0x1c] sm:$0xf]  ;;  %v997_v23 = vld [vmem:[%s1880_s18 + $0x20] sm:$0xf] }
 0x1b6   : >> { %994 = vst [vmem:[%s1876_s16 + $0x18] sm:$0xf] %v993_v21  ;;  %996 = vst [vmem:[%s1876_s16 + $0x1c] sm:$0xf] %v995_v22  ;;  %v999_v24 = vld [vmem:[%s1880_s18 + $0x24] sm:$0xf] }
 0x1b7   : >> { %998 = vst [vmem:[%s1876_s16 + $0x20] sm:$0xf] %v997_v23  ;;  %v1001_v25 = vld [vmem:[%s1880_s18 + $0x28] sm:$0xf]  ;;  %v1003_v26 = vld [vmem:[%s1880_s18 + $0x2c] sm:$0xf] }
 0x1b8   : >> { %1000 = vst [vmem:[%s1876_s16 + $0x24] sm:$0xf] %v999_v24  ;;  %1002 = vst [vmem:[%s1876_s16 + $0x28] sm:$0xf] %v1001_v25  ;;  %v1005_v27 = vld [vmem:[%s1880_s18 + $0x30] sm:$0xf] }
 0x1b9   : >> { %1004 = vst [vmem:[%s1876_s16 + $0x2c] sm:$0xf] %v1003_v26  ;;  %v1007_v28 = vld [vmem:[%s1880_s18 + $0x34] sm:$0xf]  ;;  %v1009_v29 = vld [vmem:[%s1880_s18 + $0x38] sm:$0xf] }
 0x1ba   : >> { %1006 = vst [vmem:[%s1876_s16 + $0x30] sm:$0xf] %v1005_v27  ;;  %1008 = vst [vmem:[%s1876_s16 + $0x34] sm:$0xf] %v1007_v28  ;;  %v1011_v30 = vld [vmem:[%s1880_s18 + $0x3c] sm:$0xf] }
 0x1bb   : >> { %1010 = vst [vmem:[%s1876_s16 + $0x38] sm:$0xf] %v1009_v29  ;;  %1012 = vst [vmem:[%s1876_s16 + $0x3c] sm:$0xf] %v1011_v30  ;;  %s2274_s28 = smov (%p1014_p0, %s1013_s28), 0  ;;  %s975_s25 = sadd.s32 1, %s1888_s25  }
 0x1bc   : >> { %s1347_s27 = sshll.u32 %s2274_s28, 6  ;;  %p974_p2 = scmp.ge.s32.totalorder %s975_s25, %s2151_s23 }
 0x1bd   : >> { %s1018_s18 = scalar_lea.vmem %s2114_s30, %s1347_s27 [#allocation6]   ;;  %s1019_s16 = scalar_lea.vmem %s2145_s11, %s1347_s27  }
 0x1be   : >> { %s2264_s19 = smov %s2274_s28  ;;  %977 = sbr.rel (!%p974_p2) target bundleno = 433 (0x1b1), region = 132 }
 0x1c5 PF: > { %s2223_s26 = sand.u32 15, %s2272_s9   ;;  %s1377_s21 = sshll.u32 %s2151_s23, 6 }
 0x1c6   : > { %s1024_s4 = scalar_lea.vmem %s2114_s30, %s1377_s21 [#allocation6]   ;;  %s1026_s5 = scalar_lea.vmem %s2145_s11, %s1377_s21  }
 0x1c7   : > { %p1352_p4 = scmp.le.s32.totalorder %s2223_s26, 0 }
 0x1c8   : > { %s1890_s8 = smov (!%p1352_p4), %s1026_s5   ;;  %s1894_s22 = smov (!%p1352_p4), %s1024_s4  }
 0x1c9   : > { %1201 = sbr.rel (%p1352_p4) target bundleno = 474 (0x1da), region = 137  ;;  %s1898_s24 = smov (!%p1352_p4), 0  }
 0x1ca   : > { %s1902_s29 = smov (!%p1352_p4), 0  }
 0x1d0 LB: >> { %v1036_v31 = vld [vmem:[%s1896_s22] sm:$0xf]  ;;  %s1038_s6 = sadd.s32 1, %s1900_s24  ;;  %s1030_s29 = sadd.s32 1, %s1904_s29   ;;  %s1904_s29 = sphi %s1902_s29, %s1030_s29   ;;  %s1900_s24 = sphi %s1898_s24, %s1899_s24   ;;  %s1896_s22 = sphi %s1894_s22, %s1043_s22   ;;  %s1892_s8 = sphi %s1890_s8, %s1044_s8  }
 0x1d1   : >> { %1037 = vst [vmem:[%s1892_s8] sm:$0xf] %v1036_v31  ;;  %p1039_p8 = scmp.ge.s32.totalorder %s1038_s6, %s2223_s26  ;;  %p1029_p10 = scmp.ge.s32.totalorder %s1030_s29, %s2223_s26 }
 0x1d3   : >> { %s2276_s6 = smov (%p1039_p8, %s1038_s6), 0  ;;  %1032 = sbr.rel (!%p1029_p10) target bundleno = 464 (0x1d0), region = 143 }
 0x1d4   : >> { %s1353_s30 = sshll.u32 %s2276_s6, 2  ;;  %s1899_s24 = smov %s2276_s6  }
 0x1d5   : >> { %s1043_s22 = scalar_lea.vmem %s1024_s4, %s1353_s30 [#allocation6]   ;;  %s1044_s8 = scalar_lea.vmem %s1026_s5, %s1353_s30  }
 0x1da PF: > { %p14_p13 = scmp.ge.s32.totalorder %s1954_s17, 5   ;;  %s2265_s12 = smov %s1864_s13 }
 0x1db   : > { %s2266_s13 = smov %s1868_s14  ;;  %s2267_s14 = smov %s1964_s20 }
 0x1dc   : > { %s2268_s15 = smov %s1954_s17  ;;  %16 = sbr.rel (!%p14_p13) target bundleno = 4 (0x4), region = 154 }
 0x1e3   :  { %1135 = vsyncpa [#allocation3], 1 }
 0x1e4   :  { %1137 = vsyncpa [#allocation3 + $0x1], 1 }
 0x1e5   :  { %1138 = vsyncpa [#allocation5], 1 }

</bundles_post_ra>
